<compile_context>
chip_gen: v7x
topology: tpu7x:2x2x1
jax: 0.10.0
libtpu: 0.0.40
codegen_flags: <defaults>
</compile_context>

<pallas_src>
import jax
import jax.numpy as jnp
from jax import lax
from jax.experimental import pallas as pl
from jax.experimental.pallas import tpu as pltpu

BN_EPS = 1e-5
LANE = 128


def _conv_stats_kernel(p_ref, w_ref, sum_ref, sq_ref):
    # p_ref:   (tile_r, K)  im2col rows, K = 9*Cin (taps folded into contraction)
    # w_ref:   (K, Cp)      conv weight, Cout zero-padded to Cp (lane-dense)
    # sum_ref: (1, 8, Cp)   per-tile partial per-channel sum       (row 0 = payload)
    # sq_ref:  (1, 8, Cp)   per-tile partial per-channel sum of x^2
    acc = jnp.dot(p_ref[...], w_ref[...], preferred_element_type=jnp.float32)
    s = jnp.sum(acc, axis=0, keepdims=True)        # (1, Cp)
    q = jnp.sum(acc * acc, axis=0, keepdims=True)  # (1, Cp)
    sum_ref[...] = jnp.broadcast_to(s, sum_ref.shape)
    sq_ref[...] = jnp.broadcast_to(q, sq_ref.shape)


def _conv_bn_relu_kernel(p_ref, w_ref, scale_ref, shift_ref, o_ref):
    # Recompute the conv tile on the MXU and fuse the BN affine + ReLU epilogue.
    acc = jnp.dot(p_ref[...], w_ref[...], preferred_element_type=jnp.float32)
    y = acc * scale_ref[...] + shift_ref[...]
    o_ref[...] = jnp.maximum(y, 0.0).astype(o_ref.dtype)


def conv_neck(x_nchw, w_oihw, bias, gamma, beta, *, tile_r=512):
    """PyTorch-equivalent forward of ConvNeck. Input/output are NCHW float32.

    `bias` is accepted for API parity but unused by the kernels: training-mode
    BatchNorm subtracts the per-channel batch mean immediately after the conv,
    which exactly cancels a constant per-channel bias (mathematical no-op).
    """
    del bias
    N, Cin, H, W = x_nchw.shape
    Cout = w_oihw.shape[0]
    rows = N * H * W
    K = 9 * Cin
    Cp = ((Cout + LANE - 1) // LANE) * LANE          # lane-dense output channels

    # Row tiling (multiple of 8 sublanes), zero-pad rows up to a tile multiple.
    tile_r = max(8, (min(tile_r, rows) + 7) // 8 * 8)
    num_tiles = (rows + tile_r - 1) // tile_r
    rows_pad = num_tiles * tile_r

    # --- glue (pure JAX, done once): NCHW->NHWC, pad, im2col with taps folded into K ---
    # TODO(synk): replace the materialized im2col slab with halo-block reads of the
    # padded NHWC tensor inside the kernel to cut the remaining ~9x HBM input traffic.
    x_nhwc = jnp.transpose(x_nchw, (0, 2, 3, 1)).astype(jnp.float32)
    xpad = jnp.pad(x_nhwc, ((0, 0), (1, 1), (1, 1), (0, 0)))
    taps = [xpad[:, dy:dy + H, dx:dx + W, :] for dy in range(3) for dx in range(3)]
    patches = jnp.concatenate(taps, axis=-1).reshape(rows, K)
    patches = jnp.pad(patches, ((0, rows_pad - rows), (0, 0)))
    # NOTE: keep matmul operands f32 for exact parity with the f32 PyTorch module;
    # on v6e, casting patches/w to bf16 (f32 accumulation) halves input HBM bytes.

    # (Cout, Cin, 3, 3) -> (3, 3, Cin, Cout) -> (9*Cin, Cout) -> pad Cout to Cp lanes.
    w_flat = jnp.transpose(w_oihw, (2, 3, 1, 0)).reshape(K, Cout).astype(jnp.float32)
    w_flat = jnp.pad(w_flat, ((0, 0), (0, Cp - Cout)))

    gamma_p = jnp.pad(gamma.astype(jnp.float32), (0, Cp - Cout), constant_values=1.0)
    beta_p = jnp.pad(beta.astype(jnp.float32), (0, Cp - Cout))

    patches_spec = pl.BlockSpec((tile_r, K), lambda i: (i, 0))
    weight_spec = pl.BlockSpec((K, Cp), lambda i: (0, 0))      # resident across grid
    params = pltpu.CompilerParams(dimension_semantics=("parallel",))

    # --- phase 1: conv matmul + per-tile per-channel sum / sum-of-squares ---
    sums, sqs = pl.pallas_call(
        _conv_stats_kernel,
        out_shape=(jax.ShapeDtypeStruct((num_tiles, 8, Cp), jnp.float32),
                   jax.ShapeDtypeStruct((num_tiles, 8, Cp), jnp.float32)),
        grid_spec=pltpu.PrefetchScalarGridSpec(
            num_scalar_prefetch=0,
            grid=(num_tiles,),
            in_specs=[patches_spec, weight_spec],
            out_specs=[pl.BlockSpec((1, 8, Cp), lambda i: (i, 0, 0)),
                       pl.BlockSpec((1, 8, Cp), lambda i: (i, 0, 0))]),
        compiler_params=params,
    )(patches, w_flat)

    # Tiny (Cp,)-sized reduction + BN scale/shift folding (wrapper side).
    total_s = jnp.sum(sums[:, 0, :], axis=0)
    total_q = jnp.sum(sqs[:, 0, :], axis=0)
    inv_n = 1.0 / float(rows)                      # statistics over TRUE rows only
    mean = total_s * inv_n
    var = jnp.maximum(total_q * inv_n - mean * mean, 0.0)   # biased variance
    scale = gamma_p * lax.rsqrt(var + BN_EPS)
    shift = beta_p - mean * scale
    scale2 = scale.reshape(1, Cp)
    shift2 = shift.reshape(1, Cp)

    # --- phase 2: conv matmul + fused (x*scale + shift) + ReLU, lane-dense stores ---
    out_flat = pl.pallas_call(
        _conv_bn_relu_kernel,
        out_shape=jax.ShapeDtypeStruct((rows_pad, Cp), jnp.float32),
        grid_spec=pltpu.PrefetchScalarGridSpec(
            num_scalar_prefetch=0,
            grid=(num_tiles,),
            in_specs=[patches_spec, weight_spec,
                      pl.BlockSpec((1, Cp), lambda i: (0, 0)),
                      pl.BlockSpec((1, Cp), lambda i: (0, 0))],
            out_specs=pl.BlockSpec((tile_r, Cp), lambda i: (i, 0))),
        compiler_params=params,
    )(patches, w_flat, scale2, shift2)

    out_nhwc = out_flat[:rows, :Cout].reshape(N, H, W, Cout)
    return jnp.transpose(out_nhwc, (0, 3, 1, 2))   # back to NCHW


def reference_conv_neck(x_nchw, w_oihw, bias, gamma, beta):
    """Pure-JAX reference matching torch: Conv2d(3,pad=1) -> BN2d(train) -> ReLU."""
    y = lax.conv_general_dilated(
        x_nchw, w_oihw, window_strides=(1, 1), padding="SAME",
        dimension_numbers=("NCHW", "OIHW", "NCHW"),
    ) + bias[None, :, None, None]
    mean = jnp.mean(y, axis=(0, 2, 3), keepdims=True)
    var = jnp.mean((y - mean) ** 2, axis=(0, 2, 3), keepdims=True)
    y = (y - mean) * lax.rsqrt(var + BN_EPS) * gamma[None, :, None, None] \
        + beta[None, :, None, None]
    return jnp.maximum(y, 0.0)


if __name__ == "__main__":
    N, Cin, Cout, H, W = 2, 4, 8, 16, 16

    key = jax.random.PRNGKey(0)
    kx, kw, kb = jax.random.split(key, 3)
    x = jax.random.normal(kx, (N, Cin, H, W), dtype=jnp.float32)
    # Conv2d parameters (deterministic synthetic init; PyTorch OIHW layout).
    w = jax.random.normal(kw, (Cout, Cin, 3, 3), dtype=jnp.float32) * 0.1
    b = jax.random.normal(kb, (Cout,), dtype=jnp.float32) * 0.1
    # BatchNorm2d default init: weight=1, bias=0.
    gamma = jnp.ones((Cout,), dtype=jnp.float32)
    beta = jnp.zeros((Cout,), dtype=jnp.float32)

    # tile_r=128 -> 4 row tiles: exercises the grid + two-phase BN-stat path.
    out = conv_neck(x, w, b, gamma, beta, tile_r=128)
    out = jax.block_until_ready(out)

    ref = reference_conv_neck(x, w, b, gamma, beta)
    assert out.shape == (N, Cout, H, W), out.shape
    max_err = float(jnp.max(jnp.abs(out - ref)))
    assert jnp.allclose(out, ref, atol=2e-4, rtol=2e-4), max_err

    print("KERNEL_OK")
</pallas_src>

<mosaic_0001>
module attributes {stable_mosaic.version = 11 : i64} {
  func.func @_conv_stats_kernel(%arg0: i32, %arg1: memref<128x36xf32, #tpu.memory_space<vmem>>, %arg2: memref<36x128xf32, #tpu.memory_space<vmem>>, %arg3: memref<1x8x128xf32, #tpu.memory_space<vmem>>, %arg4: memref<1x8x128xf32, #tpu.memory_space<vmem>>) attributes {dimension_semantics = [#tpu.dimension_semantics<parallel>], iteration_bounds = array<i64: 4>, scalar_prefetch = 0 : i64, scratch_operands = 0 : i64, tpu.core_type = #tpu.core_type<tc>, window_params = [{transform_indices = @transform_0, window_bounds = array<i64: 128, 36>}, {pipeline_mode = #tpu.pipeline_mode<synchronous>, transform_indices = @transform_1, window_bounds = array<i64: 36, 128>}, {transform_indices = @transform_2, window_bounds = array<i64: 1, 8, 128>}, {transform_indices = @transform_3, window_bounds = array<i64: 1, 8, 128>}]} {
    %c0 = arith.constant 0 : index
    %c0_0 = arith.constant 0 : index
    %0 = vector.load %arg1[%c0, %c0_0] : memref<128x36xf32, #tpu.memory_space<vmem>>, vector<128x36xf32>
    %c0_1 = arith.constant 0 : index
    %c0_2 = arith.constant 0 : index
    %1 = vector.load %arg2[%c0_1, %c0_2] : memref<36x128xf32, #tpu.memory_space<vmem>>, vector<36x128xf32>
    %cst = arith.constant dense<0.000000e+00> : vector<128x128xf32>
    %2 = tpu.matmul %0, %1, %cst {dimension_numbers = #tpu.dot_dimension_numbers<[1], [0], [0], [1], [0, 0, 1, 1], [], []>} : vector<128x36xf32>, vector<36x128xf32>, vector<128x128xf32> -> vector<128x128xf32>
    %cst_3 = arith.constant dense<0.000000e+00> : vector<128xf32>
    %3 = vector.multi_reduction <add>, %2, %cst_3 [0] : vector<128x128xf32> to vector<128xf32>
    %4 = vector.shape_cast %3 : vector<128xf32> to vector<1x128xf32>
    %5 = arith.mulf %2, %2 : vector<128x128xf32>
    %cst_4 = arith.constant dense<0.000000e+00> : vector<128xf32>
    %6 = vector.multi_reduction <add>, %5, %cst_4 [0] : vector<128x128xf32> to vector<128xf32>
    %7 = vector.shape_cast %6 : vector<128xf32> to vector<1x128xf32>
    %8 = vector.shape_cast %4 : vector<1x128xf32> to vector<1x1x128xf32>
    %9 = vector.broadcast %8 : vector<1x1x128xf32> to vector<1x8x128xf32>
    %c0_5 = arith.constant 0 : index
    %c0_6 = arith.constant 0 : index
    %c0_7 = arith.constant 0 : index
    %10 = vector.load %arg3[%c0_5, %c0_6, %c0_7] : memref<1x8x128xf32, #tpu.memory_space<vmem>>, vector<1x8x128xf32>
    tpu.vector_store %arg3[%c0_5, %c0_6, %c0_7], %9 {strides = array<i32>} : memref<1x8x128xf32, #tpu.memory_space<vmem>>, vector<1x8x128xf32>,
    %11 = vector.shape_cast %7 : vector<1x128xf32> to vector<1x1x128xf32>
    %12 = vector.broadcast %11 : vector<1x1x128xf32> to vector<1x8x128xf32>
    %c0_8 = arith.constant 0 : index
    %c0_9 = arith.constant 0 : index
    %c0_10 = arith.constant 0 : index
    %13 = vector.load %arg4[%c0_8, %c0_9, %c0_10] : memref<1x8x128xf32, #tpu.memory_space<vmem>>, vector<1x8x128xf32>
    tpu.vector_store %arg4[%c0_8, %c0_9, %c0_10], %12 {strides = array<i32>} : memref<1x8x128xf32, #tpu.memory_space<vmem>>, vector<1x8x128xf32>,
    return
  }
  func.func @transform_0(%arg0: i32) -> (i32, i32) {
    %c0_i32 = arith.constant 0 : i32
    %c0_i32_0 = arith.constant 0 : i32
    return %arg0, %c0_i32 : i32, i32
  }
  func.func @transform_1(%arg0: i32) -> (i32, i32) {
    %c0_i32 = arith.constant 0 : i32
    %c0_i32_0 = arith.constant 0 : i32
    %c0_i32_1 = arith.constant 0 : i32
    return %c0_i32, %c0_i32_0 : i32, i32
  }
  func.func @transform_2(%arg0: i32) -> (i32, i32, i32) {
    %c0_i32 = arith.constant 0 : i32
    %c0_i32_0 = arith.constant 0 : i32
    %c0_i32_1 = arith.constant 0 : i32
    return %arg0, %c0_i32, %c0_i32_0 : i32, i32, i32
  }
  func.func @transform_3(%arg0: i32) -> (i32, i32, i32) {
    %c0_i32 = arith.constant 0 : i32
    %c0_i32_0 = arith.constant 0 : i32
    %c0_i32_1 = arith.constant 0 : i32
    return %arg0, %c0_i32, %c0_i32_0 : i32, i32, i32
  }
}

</mosaic_0001>

<bundles_post_ra>
// kernel: tpu_custom_call.1
= control target key start
LH: loop header
LB: loop body
LE: loop exit
PB: predicated region body
PF: predicated region fallthrough
CT: control target
= control target key end

     0   :  { %9 = vsyncpa [#allocation3], 0  ;;  %s1035_s0 = inlined_call_operand.vmem [shape: f32[512,36], index: 0, kind: input, shape index: {}]   ;;  %s1036_s1 = inlined_call_operand.vmem [shape: f32[36,128], index: 1, kind: input, shape index: {}]   ;;  %s1037_s2 = inlined_call_operand.hbm [shape: f32[4,8,128], index: 2, kind: output, shape index: {0}]   ;;  %s1038_s3 = inlined_call_operand.hbm [shape: f32[4,8,128], index: 3, kind: output, shape index: {1}]  }
   0x1   :  { %11 = vsyncpa [#allocation3 + $0x1], 0 }
   0x2   :  { %12 = vsyncpa [#allocation5], 0 }
   0x3   :  { %14 = vsyncpa [#allocation5 + $0x1], 0  ;;  %s846_s12 = smov 0   ;;  %s848_s13 = smov 0  }
   0x4   :  { %s850_s14 = smov 0   ;;  %s852_s15 = smov 0  }
   0x5 LB: > { %s867_s16 = sadd.s32 4294967295, %s822_s15   ;;  %s584_s17 = sadd.s32 4294967294, %s822_s15   ;;  %s822_s15 = sphi %s852_s15, %s1044_s15   ;;  %s818_s14 = sphi %s850_s14, %s1043_s14   ;;  %s814_s13 = sphi %s848_s13, %s1042_s13   ;;  %s810_s12 = sphi %s846_s12, %s1041_s12  }
   0x6   : > { %s871_s18 = sadd.s32 1, %s822_s15   ;;  %s74_s19 = sadd.s32 1, %s818_s14 }
   0x7   : > { %s71_s20 = ssub.s32 %s822_s15, %s871_s18  ;;  %p84_p0 = scmp.ne.s32.totalorder %s818_s14, %s814_s13 }
   0x8   : > { %p72_p1 = scmp.eq.s32.totalorder %s71_s20, 0  ;;  %p85_p2 = scmp.eq.s32.totalorder %s867_s16, 3 }
   0x9   : > { %p90_p3 = scmp.ne.s32.totalorder %s814_s13, %s810_s12  ;;  %p91_p4 = scmp.eq.s32.totalorder %s584_s17, 3 }
   0xa   : > { %s882_s21 = scalar_select %p72_p1, %s818_s14, %s74_s19  }
   0xb   : > { %p884_p5 = por %p85_p2, %p84_p0  ;;  %p888_p6 = por %p91_p4, %p90_p3 }
   0xc   : > { %p587_p7 = scmp.ge.s32.totalorder %s822_s15, 1  ;;  %p147_p8 = scmp.lt.s32.totalorder %s822_s15, 5 }
   0xe   : > { %p148_p9 = pnand %p587_p7, %p147_p8 }
   0xf   : > { %v198_v0 = vld [vmem:[%s1036_s1] sm:$0xff] (!%p148_p9)  ;;  %v199_v1 = vld [vmem:[%s1036_s1 + $0x8] sm:$0xff] (!%p148_p9)  ;;  %v200_v2 = vld [vmem:[%s1036_s1 + $0x10] sm:$0xff] (!%p148_p9)  ;;  %s590_s30 = sshll.u32 (!%p148_p9), %s867_s16, 4  ;;  %vm203_vm0 = vcmask (!%p148_p9), 293888   ;;  %vm252_vm1 = vcmask (!%p148_p9), 1043456  }
  0x10   : > { %151 = sbr.rel (%p148_p9) target bundleno = 322 (0x142), region = 28  ;;  %v670_v3 = vpack.c.bf16 (!%p148_p9), %v199_v1, %v198_v0  ;;  %v201_v4 = vld [vmem:[%s1036_s1 + $0x18] sm:$0xff] (!%p148_p9)  ;;  %p177_p10 = scmp.lt.s32.totalorder (!%p148_p9), %s590_s30, 63  ;;  %v202_v6 = vld [vmem:[%s1036_s1 + $0x20] sm:$0xf] (!%p148_p9) }
  0x11   : > { %v674_v5 = vpack.c.bf16 (!%p148_p9), %v201_v4, %v200_v2  ;;  %s952_s17 = sand.u32 (!%p148_p9), 1, %s814_s13   ;;  %s611_s20 = sshll.u32 (!%p148_p9), %s867_s16, 7 }
  0x12   : > { %671 = vmatprep.subr.bf16.mxu0 (!%p148_p9), %v670_v3  ;;  %678 = vmatprep.subr.bf16.mxu1 (!%p148_p9), %v670_v3  ;;  %s588_s19 = sshll.u32 (!%p148_p9), %s952_s17, 3  ;;  %s969_s5 = scalar_lea.hbm (!%p148_p9), %s1038_s3, %s611_s20 }
  0x13   : > { %673 = vmatpush3.bf16.msra.mxu0 (!%p148_p9), %v670_v3  ;;  %681 = vmatpush3.bf16.msra.mxu1 (!%p148_p9), %v670_v3  ;;  %s168_s24 = scalar_lea.vmem (!%p148_p9), [#allocation2], %s588_s19  ;;  %s956_s26 = scalar_lea.vmem (!%p148_p9), [#allocation4], %s588_s19 }
  0x14   : > { %675 = vmatprep.subr.bf16.mxu0 (!%p148_p9), %v674_v5  ;;  %679 = vmatprep.subr.bf16.mxu1 (!%p148_p9), %v674_v5  ;;  %s480_s25 = sshll.u32 (!%p148_p9), %s168_s24, 4  ;;  %s493_s27 = sshll.u32 (!%p148_p9), %s956_s26, 4  ;;  %s964_s25 = int_to_ptr.vmem [resolvable:$true] %s480_s25  ;;  %s971_s27 = int_to_ptr.vmem [resolvable:$true] %s493_s27 }
  0x15   : > { %s728_s7 = scalar_lea.vmem (!%p148_p9), %s964_s25, 128  ;;  %s824_s8 = smov (!%p148_p9), [#allocation2]  }
  0x16   : > { %p729_p11 = scmp.ne.s32.totalorder (!%p148_p9), %s964_s25, %s728_s7  ;;  %s732_s9 = sshll.u32 (!%p148_p9), %s824_s8, 4  ;;  %s733_s9 = int_to_ptr.vmem [resolvable:$false] %s732_s9 }
  0x17   : > { %s1046_s30 = smov (!%p177_p10, %s590_s30), 63  ;;  %677 = vmatpush3.bf16.msra.mxu0 %v674_v5  ;;  %682 = vmatpush3.bf16.msra.mxu1 %v674_v5  ;;  %s734_s10 = scalar_lea.vmem %s733_s9, 256 }
  0x18   : > { %s591_s6 = sshll.u32 %s1046_s30, 3  ;;  %644 = vmatprep.subr.msk.mxu0 %vm252_vm1, %v202_v6  ;;  %680 = vmatprep.subr.msk.mxu1 %vm252_vm1, %v202_v6  ;;  %s962_s30 = scalar_lea.hbm %s1037_s2, %s611_s20 }
  0x19   : > { %s913_s11 = scalar_lea.vmem %s1035_s0, %s591_s6  ;;  %s462_s6 = scalar_lea.sflag [#allocation3], %s952_s17 }
  0x1a   : > { %v182_v7 = vld [vmem:[%s913_s11] sm:$0xff]  ;;  %v183_v9 = vld [vmem:[%s913_s11 + $0x8] sm:$0xff]  ;;  %v184_v10 = vld [vmem:[%s913_s11 + $0x10] sm:$0xff]  ;;  %p730_p12 = pnand %p729_p11, %p884_p5  ;;  %p735_p0 = scmp.lt.s32.totalorder %s964_s25, %s733_s9 }
  0x1b   : > { %646 = vmatprep.mubr.msk.f32.mxu0 %vm203_vm0, %v182_v7  ;;  %v190_v8 = vld [vmem:[%s913_s11 + $0x40] sm:$0xff]  ;;  %v191_v11 = vld [vmem:[%s913_s11 + $0x48] sm:$0xff]  ;;  %645 = vmatpush3.msk.msra.mxu0 %vm252_vm1, %v202_v6  ;;  %v192_v12 = vld [vmem:[%s913_s11 + $0x50] sm:$0xff]  ;;  %p736_p1 = scmp.lt.s32.totalorder %s734_s10, %s728_s7 }
  0x1c   : > { %658 = vmatprep.mubr.msk.f32.mxu1 %vm203_vm0, %v190_v8  ;;  %647 = vmatmul.mubr.msk.f32.vlgmr.msra.gmra.mrb[0].mxu0 %vm203_vm0, %v183_v9  ;;  %v185_v13 = vld [vmem:[%s913_s11 + $0x18] sm:$0xff]  ;;  %v186_v14 = vld [vmem:[%s913_s11 + $0x20] sm:$0xff]  ;;  %v187_v17 = vld [vmem:[%s913_s11 + $0x28] sm:$0xff]  ;;  %p731_p13 = pneg %p730_p12 }
  0x1d   : > { %683 = vmatpush3.msk.msra.mxu1 %vm252_vm1, %v202_v6  ;;  %649 = vmatprep.mubr.msk.f32.mxu0 %vm203_vm0, %v184_v10  ;;  %v193_v15 = vld [vmem:[%s913_s11 + $0x58] sm:$0xff]  ;;  %v194_v16 = vld [vmem:[%s913_s11 + $0x60] sm:$0xff]  ;;  %v188_v18 = vld [vmem:[%s913_s11 + $0x30] sm:$0xff]  ;;  %p737_p2 = por %p736_p1, %p735_p0 }
  0x1e   : > { %659 = vmatmul.mubr.msk.f32.vlgmr.msra.gmra.mrb[0].mxu1 %vm203_vm0, %v191_v11  ;;  %v195_v19 = vld [vmem:[%s913_s11 + $0x68] sm:$0xff]  ;;  %v196_v20 = vld [vmem:[%s913_s11 + $0x70] sm:$0xff]  ;;  %v189_v21 = vld [vmem:[%s913_s11 + $0x38] sm:$0xff] }
  0x1f   : > { %661 = vmatprep.mubr.msk.f32.mxu1 %vm203_vm0, %v192_v12  ;;  %v197_v22 = vld [vmem:[%s913_s11 + $0x78] sm:$0xff]  ;;  %p738_p3 = pnand %p737_p2, %p731_p13 }
  0x20   : > { %650 = vmatmul.mubr.msk.f32.gmra.mrb[2].mxu0 %vm203_vm0, %v185_v13 }
  0x21   : > { %652 = vmatprep.mubr.msk.f32.mxu0 %vm203_vm0, %v186_v14 }
  0x22   : > { %662 = vmatmul.mubr.msk.f32.gmra.mrb[2].mxu1 %vm203_vm0, %v193_v15 }
  0x23   : > { %664 = vmatprep.mubr.msk.f32.mxu1 %vm203_vm0, %v194_v16 }
  0x24   : > { %653 = vmatmul.mubr.msk.f32.gmra.mrb[4].mxu0 %vm203_vm0, %v187_v17 }
  0x25   : > { %655 = vmatprep.mubr.msk.f32.mxu0 %vm203_vm0, %v188_v18 }
  0x26   : > { %665 = vmatmul.mubr.msk.f32.gmra.mrb[4].mxu1 %vm203_vm0, %v195_v19 }
  0x27   : > { %667 = vmatprep.mubr.msk.f32.mxu1 %vm203_vm0, %v196_v20 }
  0x28   : > { %656 = vmatmul.mubr.msk.f32.gmra.mrb[6].mxu0 %vm203_vm0, %v189_v21 }
  0x2a   : > { %668 = vmatmul.mubr.msk.f32.gmra.mrb[6].mxu1 %vm203_vm0, %v197_v22 }
  0xef   : > { %v648_v23 = vpop.f32.mrb[0].mxu0 }
  0xf0   : > { %v423_v24 = vmul.f32 %v648_v23, %v648_v23  ;;  %v322_v25 = vpop.f32.mrb[1].mxu0 }
  0xf1   : > { %v660_v26 = vpop.f32.mrb[0].mxu1  ;;  %v401_v27 = vadd.f32 %v648_v23, %v322_v25  ;;  %v422_v28 = vmul.f32 %v322_v25, %v322_v25 }
  0xf2   : > { %v362_v29 = vpop.f32.mrb[1].mxu1  ;;  %v431_v63 = vmul.f32 %v660_v26, %v660_v26 }
  0xf3   : > { %v438_v30 = vadd.f32 %v423_v24, %v422_v28  ;;  %v651_v31 = vpop.f32.mrb[2].mxu0  ;;  %v430_v60 = vmul.f32 %v362_v29, %v362_v29 }
  0xf4   : > { %v332_v32 = vpop.f32.mrb[3].mxu0  ;;  %v425_v37 = vmul.f32 %v651_v31, %v651_v31 }
  0xf5   : > { %v663_v33 = vpop.f32.mrb[2].mxu1  ;;  %v402_v34 = vadd.f32 %v401_v27, %v332_v32  ;;  %v424_v35 = vmul.f32 %v332_v32, %v332_v32 }
  0xf6   : > { %v372_v36 = vpop.f32.mrb[3].mxu1  ;;  %v433_v5 = vmul.f32 %v663_v33, %v663_v33 }
  0xf7   : > { %v439_v38 = vadd.f32 %v438_v30, %v424_v35  ;;  %v654_v39 = vpop.f32.mrb[4].mxu0  ;;  %v403_v40 = vadd.f32 %v651_v31, %v402_v34  ;;  %v432_v2 = vmul.f32 %v372_v36, %v372_v36 }
  0xf8   : > { %v342_v41 = vpop.f32.mrb[5].mxu0  ;;  %v427_v47 = vmul.f32 %v654_v39, %v654_v39 }
  0xf9   : > { %v666_v42 = vpop.f32.mrb[4].mxu1  ;;  %v404_v43 = vadd.f32 %v403_v40, %v342_v41  ;;  %v426_v44 = vmul.f32 %v342_v41, %v342_v41  ;;  %v440_v45 = vadd.f32 %v439_v38, %v425_v37 }
  0xfa   : > { %v382_v46 = vpop.f32.mrb[5].mxu1  ;;  %v435_v11 = vmul.f32 %v666_v42, %v666_v42 }
  0xfb   : > { %v441_v48 = vadd.f32 %v440_v45, %v426_v44  ;;  %v657_v49 = vpop.f32.mrb[6].mxu0  ;;  %v405_v50 = vadd.f32 %v654_v39, %v404_v43  ;;  %v434_v8 = vmul.f32 %v382_v46, %v382_v46 }
  0xfc   : > { %v352_v51 = vpop.f32.mrb[7].mxu0  ;;  %v429_v57 = vmul.f32 %v657_v49, %v657_v49 }
  0xfd   : > { %v669_v52 = vpop.f32.mrb[6].mxu1  ;;  %v406_v53 = vadd.f32 %v405_v50, %v352_v51  ;;  %v428_v54 = vmul.f32 %v352_v51, %v352_v51  ;;  %v442_v55 = vadd.f32 %v441_v48, %v427_v47 }
  0xfe   : > { %v392_v56 = vpop.f32.mrb[7].mxu1  ;;  %v437_v17 = vmul.f32 %v669_v52, %v669_v52 }
  0xff   : > { %v407_v58 = vadd.f32 %v657_v49, %v406_v53  ;;  %v443_v59 = vadd.f32 %v442_v55, %v428_v54  ;;  %v436_v14 = vmul.f32 %v392_v56, %v392_v56 }
 0x101   : > { %v444_v61 = vadd.f32 %v443_v59, %v429_v57  ;;  %v408_v62 = vadd.f32 %v407_v58, %v362_v29 }
 0x103   : > { %v445_v0 = vadd.f32 %v444_v61, %v430_v60  ;;  %v409_v1 = vadd.f32 %v660_v26, %v408_v62 }
 0x105   : > { %v410_v3 = vadd.f32 %v409_v1, %v372_v36  ;;  %v446_v4 = vadd.f32 %v445_v0, %v431_v63 }
 0x107   : > { %v447_v6 = vadd.f32 %v446_v4, %v432_v2  ;;  %v411_v7 = vadd.f32 %v663_v33, %v410_v3 }
 0x109   : > { %v412_v9 = vadd.f32 %v411_v7, %v382_v46  ;;  %v448_v10 = vadd.f32 %v447_v6, %v433_v5 }
 0x10b   : > { %v449_v12 = vadd.f32 %v448_v10, %v434_v8  ;;  %v413_v13 = vadd.f32 %v666_v42, %v412_v9 }
 0x10d   : > { %v414_v15 = vadd.f32 %v413_v13, %v392_v56  ;;  %v450_v16 = vadd.f32 %v449_v12, %v435_v11 }
 0x10f   : > { %v415_v18 = vadd.f32 %v669_v52, %v414_v15  ;;  %v451_v19 = vadd.f32 %v450_v16, %v436_v14 }
 0x111   : > { %v416_v20 = vrot.slane %v415_v18, 4  ;;  %v452_v21 = vadd.f32 %v451_v19, %v437_v17 }
 0x113   : > { %v417_v22 = vadd.f32 %v416_v20, %v415_v18  ;;  %v453_v23 = vrot.slane %v452_v21, 4 }
 0x115   : > { %v418_v24 = vrot.slane %v417_v22, 2  ;;  %v454_v25 = vadd.f32 %v453_v23, %v452_v21 }
 0x117   : > { %v419_v26 = vadd.f32 %v418_v24, %v417_v22  ;;  %v455_v27 = vrot.slane %v454_v25, 2 }
 0x119   : > { %v420_v28 = vrot.slane %v419_v26, 1  ;;  %v456_v29 = vadd.f32 %v455_v27, %v454_v25 }
 0x11b   : > { %v421_v30 = vadd.f32 %v420_v28, %v419_v26  ;;  %v457_v31 = vrot.slane %v456_v29, 1 }
 0x11d   : > { %459 = vst [vmem:[%s168_s24] sm:$0xff] %v421_v30  ;;  %v458_v32 = vadd.f32 %v457_v31, %v456_v29 }
 0x11e   : > { %741 = shalt.err (!%p738_p3)
}
 0x11f   : > { %s742_s11 = scalar_lea.hbm %s962_s30, 128  ;;  %s746_s24 = scalar_lea.hbm %s1037_s2, 512 }
 0x120   : > { %p743_p4 = scmp.ne.s32.totalorder %s962_s30, %s742_s11  ;;  %p747_p9 = scmp.lt.u32.totalorder %s962_s30, %s1037_s2 }
 0x121   : > { %p748_p10 = scmp.lt.u32.totalorder %s746_s24, %s742_s11  ;;  %p750_p12 = scmp.lt.u32.totalorder %s742_s11, %s962_s30 }
 0x122   : > { %p744_p7 = pnand %p743_p4, %p884_p5 }
 0x123   : > { %p749_p11 = por %p748_p10, %p747_p9 }
 0x124   : > { %p745_p8 = pneg %p744_p7 }
 0x125   : > { %p751_p13 = por %p750_p12, %p749_p11 }
 0x127   : > { %p752_p0 = pnand %p751_p13, %p745_p8 }
 0x129   : > { %755 = shalt.err (!%p752_p0)
}
 0x12a   : > { %684 = dma.vmem_to_hbm [thread:$0]  (%p884_p5), %s964_s25, 128, %s962_s30, %s462_s6   ;;  %460 = vst [vmem:[%s956_s26] sm:$0xff] %v458_v32 }
 0x12b   : > { %s467_s16 = scalar_lea.sflag [#allocation5], %s952_s17  ;;  %s756_s4 = scalar_lea.vmem %s971_s27, 128 }
 0x12c   : > { %p757_p1 = scmp.ne.s32.totalorder %s971_s27, %s756_s4  ;;  %s825_s7 = smov [#allocation4]  }
 0x12d   : > { %s760_s8 = sshll.u32 %s825_s7, 4  ;;  %s761_s8 = int_to_ptr.vmem [resolvable:$false] %s760_s8 }
 0x12e   : > { %p758_p2 = pnand %p757_p1, %p884_p5  ;;  %s762_s9 = scalar_lea.vmem %s761_s8, 256 }
 0x12f   : > { %p763_p4 = scmp.lt.s32.totalorder %s971_s27, %s761_s8  ;;  %p764_p7 = scmp.lt.s32.totalorder %s762_s9, %s756_s4 }
 0x130   : > { %p759_p3 = pneg %p758_p2 }
 0x131   : > { %p765_p8 = por %p764_p7, %p763_p4 }
 0x133   : > { %p766_p9 = pnand %p765_p8, %p759_p3 }
 0x135   : > { %769 = shalt.err (!%p766_p9)
}
 0x136   : > { %s770_s17 = scalar_lea.hbm %s969_s5, 128  ;;  %s774_s30 = scalar_lea.hbm %s1038_s3, 512 }
 0x137   : > { %p771_p10 = scmp.ne.s32.totalorder %s969_s5, %s770_s17  ;;  %p775_p13 = scmp.lt.u32.totalorder %s969_s5, %s1038_s3 }
 0x138   : > { %p776_p0 = scmp.lt.u32.totalorder %s774_s30, %s770_s17  ;;  %p778_p2 = scmp.lt.u32.totalorder %s770_s17, %s969_s5 }
 0x139   : > { %p772_p11 = pnand %p771_p10, %p884_p5 }
 0x13a   : > { %p777_p1 = por %p776_p0, %p775_p13 }
 0x13b   : > { %p773_p12 = pneg %p772_p11 }
 0x13c   : > { %p779_p3 = por %p778_p2, %p777_p1 }
 0x13e   : > { %p780_p4 = pnand %p779_p3, %p773_p12 }
 0x140   : > { %783 = shalt.err (!%p780_p4)
}
 0x141   : > { %685 = dma.vmem_to_hbm [thread:$0]  (%p884_p5), %s971_s27, 128, %s969_s5, %s467_s16  }
 0x142 PF: > { %p695_p7 = scmp.ge.s32.totalorder %s822_s15, 2  ;;  %s505_s11 = sand.u32 1, %s810_s12  }
 0x143   : > { %s506_s19 = scalar_lea.sflag [#allocation3], %s505_s11 }
 0x144   : > { %p689_p8 = pnand %p695_p7, %p888_p6 }
 0x146   : > { %801 = dma.done.wait (!%p689_p8), %s506_s19, 128  }
 0x147   : > { %803 = vsyncadd (!%p689_p8), %s506_s19, 4294967168  ;;  %s515_s20 = scalar_lea.sflag [#allocation5], %s505_s11 }
 0x148   : > { %805 = dma.done.wait (!%p689_p8), %s515_s20, 128  }
 0x149   : > { %807 = vsyncadd (!%p689_p8), %s515_s20, 4294967168  ;;  %p17_p5 = scmp.ge.s32.totalorder %s871_s18, 6   ;;  %s1041_s12 = smov %s814_s13 }
 0x14a   : > { %s1042_s13 = smov %s818_s14  ;;  %s1043_s14 = smov %s882_s21 }
 0x14b   : > { %s1044_s15 = smov %s871_s18  ;;  %19 = sbr.rel (!%p17_p5) target bundleno = 5 (0x5), region = 80 }
 0x152   :  { %520 = vsyncpa [#allocation3], 1 }
 0x153   :  { %522 = vsyncpa [#allocation3 + $0x1], 1 }
 0x154   :  { %523 = vsyncpa [#allocation5], 1 }
 0x155   :  { %525 = vsyncpa [#allocation5 + $0x1], 1 }

</bundles_post_ra>
